<compile_context>
chip_gen: v6e
topology: v6e:2x2x1
jax: 0.10.0
libtpu: 0.0.40
codegen_flags: <defaults>
</compile_context>

<pallas_src>
import jax
import jax.numpy as jnp
from jax.experimental import pallas as pl
from jax.experimental.pallas import tpu as pltpu


def _mlp_kernel(x_ref, w1_ref, b1_ref, w2_ref, b2_ref, o_ref):
    # x_ref : (TB, E)  bf16     w1_ref : (E, H)    bf16   b1_ref : (1, H)    f32
    # w2_ref: (H, Op)  bf16     b2_ref : (1, Op)   f32    o_ref  : (TB, Op)  f32
    # l1: x @ W1^T + b1  (weights pre-transposed to (in, out)), f32 accumulation.
    h = jnp.dot(x_ref[...], w1_ref[...], preferred_element_type=jnp.float32)
    h = h + b1_ref[...]

    # SiLU in f32: h * sigmoid(h) (sigmoid goes to the EUP slot).
    h = h * jax.nn.sigmoid(h)

    # dropout(p=0.15): identity in eval mode.

    # l2: h @ W2^T + b2, bf16 operands, f32 accumulation, lane-dense (Op=128) output.
    out = jnp.dot(h.astype(jnp.bfloat16), w2_ref[...],
                  preferred_element_type=jnp.float32)
    out = out + b2_ref[...]
    o_ref[...] = out.astype(o_ref.dtype)


def predict_next_cluster(x, w1_t, b1, w2_t, b2, *, tb=None):
    """x: (B, E) float32. w1_t: (E, H), b1: (H,), w2_t: (H, O), b2: (O,).

    Weights are the PyTorch nn.Linear weights pre-transposed to (in, out).
    Returns (B, O) float32.
    """
    B, E = x.shape
    H = w1_t.shape[1]
    O = w2_t.shape[1]

    # --- lane-dense output: pad O up to a multiple of 128 --------------------
    O_pad = max(128, ((O + 127) // 128) * 128)
    w2_p = jnp.zeros((H, O_pad), dtype=w2_t.dtype).at[:, :O].set(w2_t)
    b2_p = jnp.zeros((O_pad,), dtype=b2.dtype).at[:O].set(b2)

    # --- batch tiling: cap tile size, keep multiple of 8 sublanes ------------
    if tb is None:
        tb = min(512, max(8, ((B + 7) // 8) * 8))
    tb = max(8, (tb // 8) * 8)
    B_pad = ((B + tb - 1) // tb) * tb
    x_p = x if B_pad == B else jnp.pad(x, ((0, B_pad - B), (0, 0)))

    # --- bf16 MXU operands, f32 accumulation / biases ------------------------
    x_bf = x_p.astype(jnp.bfloat16)
    w1_bf = w1_t.astype(jnp.bfloat16)
    w2_bf = w2_p.astype(jnp.bfloat16)
    b1_2d = b1.reshape(1, H).astype(jnp.float32)
    b2_2d = b2_p.reshape(1, O_pad).astype(jnp.float32)

    grid = (B_pad // tb,)

    bytes_accessed = (
        x_bf.size * 2 + w1_bf.size * 2 + w2_bf.size * 2
        + b1_2d.size * 4 + b2_2d.size * 4 + B_pad * O_pad * 4
    )
    cost = pl.CostEstimate(
        flops=2 * B_pad * (E * H + H * O_pad),
        transcendentals=B_pad * H,
        bytes_accessed=bytes_accessed,
    )

    out = pl.pallas_call(
        _mlp_kernel,
        out_shape=jax.ShapeDtypeStruct((B_pad, O_pad), jnp.float32),
        grid_spec=pltpu.PrefetchScalarGridSpec(
            num_scalar_prefetch=0,
            grid=grid,
            in_specs=[
                pl.BlockSpec((tb, E), lambda i: (i, 0)),        # x tile (streamed)
                pl.BlockSpec((E, H), lambda i: (0, 0)),         # W1^T  (resident)
                pl.BlockSpec((1, H), lambda i: (0, 0)),         # b1    (resident)
                pl.BlockSpec((H, O_pad), lambda i: (0, 0)),     # W2^T  (resident, padded)
                pl.BlockSpec((1, O_pad), lambda i: (0, 0)),     # b2    (resident, padded)
            ],
            out_specs=pl.BlockSpec((tb, O_pad), lambda i: (i, 0)),
        ),
        compiler_params=pltpu.CompilerParams(
            dimension_semantics=("parallel",),
        ),
        cost_estimate=cost,
    )(x_bf, w1_bf, b1_2d, w2_bf, b2_2d)

    # Strip the batch / lane padding.
    return out[:B, :O]


def reference_mlp(x, w1_t, b1, w2_t, b2):
    h = x @ w1_t + b1
    h = h * jax.nn.sigmoid(h)
    return h @ w2_t + b2


if __name__ == "__main__":
    # Small shapes consistent with the module: emb_size=32, hid_size=256, outp_size=11.
    B, E, H, O = 8, 32, 256, 11

    key = jax.random.PRNGKey(0)
    k_x, k_w1, k_b1, k_w2, k_b2 = jax.random.split(key, 5)

    x = jax.random.normal(k_x, (B, E), dtype=jnp.float32)

    # Deterministic parameter init mimicking nn.Linear (uniform in +-1/sqrt(fan_in)),
    # stored pre-transposed as (in, out).
    lim1 = 1.0 / jnp.sqrt(E)
    w1_t = jax.random.uniform(k_w1, (E, H), minval=-lim1, maxval=lim1, dtype=jnp.float32)
    b1 = jax.random.uniform(k_b1, (H,), minval=-lim1, maxval=lim1, dtype=jnp.float32)

    lim2 = 1.0 / jnp.sqrt(H)
    w2_t = jax.random.uniform(k_w2, (H, O), minval=-lim2, maxval=lim2, dtype=jnp.float32)
    b2 = jax.random.uniform(k_b2, (O,), minval=-lim2, maxval=lim2, dtype=jnp.float32)

    out = predict_next_cluster(x, w1_t, b1, w2_t, b2)
    out = jax.block_until_ready(out)

    ref = reference_mlp(x, w1_t, b1, w2_t, b2)
    assert out.shape == (B, O)
    # bf16 MXU operands with f32 accumulation -> loosened tolerance.
    assert jnp.allclose(out, ref, atol=2e-2, rtol=2e-2), float(jnp.max(jnp.abs(out - ref)))

    print("KERNEL_OK")
</pallas_src>

<mosaic_0001>
module attributes {stable_mosaic.version = 11 : i64} {
  func.func @_mlp_kernel(%arg0: i32, %arg1: memref<8x32xbf16, #tpu.memory_space<vmem>>, %arg2: memref<32x256xbf16, #tpu.memory_space<vmem>>, %arg3: memref<1x256xf32, #tpu.memory_space<vmem>>, %arg4: memref<256x128xbf16, #tpu.memory_space<vmem>>, %arg5: memref<1x128xf32, #tpu.memory_space<vmem>>, %arg6: memref<8x128xf32, #tpu.memory_space<vmem>>) attributes {dimension_semantics = [#tpu.dimension_semantics<parallel>], iteration_bounds = array<i64: 1>, scalar_prefetch = 0 : i64, scratch_operands = 0 : i64, tpu.core_type = #tpu.core_type<tc>, window_params = [{transform_indices = @transform_0, window_bounds = array<i64: 8, 32>}, {pipeline_mode = #tpu.pipeline_mode<synchronous>, transform_indices = @transform_1, window_bounds = array<i64: 32, 256>}, {pipeline_mode = #tpu.pipeline_mode<synchronous>, transform_indices = @transform_2, window_bounds = array<i64: 1, 256>}, {pipeline_mode = #tpu.pipeline_mode<synchronous>, transform_indices = @transform_3, window_bounds = array<i64: 256, 128>}, {pipeline_mode = #tpu.pipeline_mode<synchronous>, transform_indices = @transform_4, window_bounds = array<i64: 1, 128>}, {transform_indices = @transform_5, window_bounds = array<i64: 8, 128>}]} {
    %c0 = arith.constant 0 : index
    %c0_0 = arith.constant 0 : index
    %0 = vector.load %arg1[%c0, %c0_0] : memref<8x32xbf16, #tpu.memory_space<vmem>>, vector<8x32xbf16>
    %c0_1 = arith.constant 0 : index
    %c0_2 = arith.constant 0 : index
    %1 = vector.load %arg2[%c0_1, %c0_2] : memref<32x256xbf16, #tpu.memory_space<vmem>>, vector<32x256xbf16>
    %cst = arith.constant dense<0.000000e+00> : vector<8x256xf32>
    %2 = tpu.matmul %0, %1, %cst {dimension_numbers = #tpu.dot_dimension_numbers<[1], [0], [0], [1], [0, 0, 1, 1], [], []>} : vector<8x32xbf16>, vector<32x256xbf16>, vector<8x256xf32> -> vector<8x256xf32>
    %c0_3 = arith.constant 0 : index
    %c0_4 = arith.constant 0 : index
    %3 = vector.load %arg3[%c0_3, %c0_4] : memref<1x256xf32, #tpu.memory_space<vmem>>, vector<1x256xf32>
    %4 = vector.broadcast %3 : vector<1x256xf32> to vector<8x256xf32>
    %5 = arith.addf %2, %4 : vector<8x256xf32>
    %6 = arith.negf %5 : vector<8x256xf32>
    %7 = math.exp %6 : vector<8x256xf32>
    %cst_5 = arith.constant 1.000000e+00 : f32
    %8 = vector.broadcast %cst_5 : f32 to vector<8x256xf32>
    %9 = arith.addf %8, %7 : vector<8x256xf32>
    %10 = arith.divf %8, %9 : vector<8x256xf32>
    %11 = arith.mulf %5, %10 : vector<8x256xf32>
    %12 = arith.truncf %11 : vector<8x256xf32> to vector<8x256xbf16>
    %c0_6 = arith.constant 0 : index
    %c0_7 = arith.constant 0 : index
    %13 = vector.load %arg4[%c0_6, %c0_7] : memref<256x128xbf16, #tpu.memory_space<vmem>>, vector<256x128xbf16>
    %cst_8 = arith.constant dense<0.000000e+00> : vector<8x128xf32>
    %14 = tpu.matmul %12, %13, %cst_8 {dimension_numbers = #tpu.dot_dimension_numbers<[1], [0], [0], [1], [0, 0, 1, 1], [], []>} : vector<8x256xbf16>, vector<256x128xbf16>, vector<8x128xf32> -> vector<8x128xf32>
    %c0_9 = arith.constant 0 : index
    %c0_10 = arith.constant 0 : index
    %15 = vector.load %arg5[%c0_9, %c0_10] : memref<1x128xf32, #tpu.memory_space<vmem>>, vector<1x128xf32>
    %16 = vector.broadcast %15 : vector<1x128xf32> to vector<8x128xf32>
    %17 = arith.addf %14, %16 : vector<8x128xf32>
    %c0_11 = arith.constant 0 : index
    %c0_12 = arith.constant 0 : index
    %18 = vector.load %arg6[%c0_11, %c0_12] : memref<8x128xf32, #tpu.memory_space<vmem>>, vector<8x128xf32>
    tpu.vector_store %arg6[%c0_11, %c0_12], %17 {strides = array<i32>} : memref<8x128xf32, #tpu.memory_space<vmem>>, vector<8x128xf32>,
    return
  }
  func.func @transform_0(%arg0: i32) -> (i32, i32) {
    %c0_i32 = arith.constant 0 : i32
    %c0_i32_0 = arith.constant 0 : i32
    return %arg0, %c0_i32 : i32, i32
  }
  func.func @transform_1(%arg0: i32) -> (i32, i32) {
    %c0_i32 = arith.constant 0 : i32
    %c0_i32_0 = arith.constant 0 : i32
    %c0_i32_1 = arith.constant 0 : i32
    return %c0_i32, %c0_i32_0 : i32, i32
  }
  func.func @transform_2(%arg0: i32) -> (i32, i32) {
    %c0_i32 = arith.constant 0 : i32
    %c0_i32_0 = arith.constant 0 : i32
    %c0_i32_1 = arith.constant 0 : i32
    return %c0_i32, %c0_i32_0 : i32, i32
  }
  func.func @transform_3(%arg0: i32) -> (i32, i32) {
    %c0_i32 = arith.constant 0 : i32
    %c0_i32_0 = arith.constant 0 : i32
    %c0_i32_1 = arith.constant 0 : i32
    return %c0_i32, %c0_i32_0 : i32, i32
  }
  func.func @transform_4(%arg0: i32) -> (i32, i32) {
    %c0_i32 = arith.constant 0 : i32
    %c0_i32_0 = arith.constant 0 : i32
    %c0_i32_1 = arith.constant 0 : i32
    return %c0_i32, %c0_i32_0 : i32, i32
  }
  func.func @transform_5(%arg0: i32) -> (i32, i32) {
    %c0_i32 = arith.constant 0 : i32
    %c0_i32_0 = arith.constant 0 : i32
    return %arg0, %c0_i32 : i32, i32
  }
}

</mosaic_0001>

<bundles_post_ra>
// kernel: tpu_custom_call.1
= control target key start
LH: loop header
LB: loop body
LE: loop exit
PB: predicated region body
PF: predicated region fallthrough
CT: control target
= control target key end

     0   :  { %10 = vsyncpa [#allocation3], 0  ;;  %s579_s0 = inlined_call_operand.hbm [shape: bf16[8,32], index: 0, kind: input, shape index: {}]   ;;  %s580_s1 = inlined_call_operand.hbm [shape: bf16[32,256], index: 1, kind: input, shape index: {}]   ;;  %s581_s2 = inlined_call_operand.vmem [shape: f32[1,256], index: 2, kind: input, shape index: {}]   ;;  %s582_s3 = inlined_call_operand.hbm [shape: bf16[256,128], index: 3, kind: input, shape index: {}]   ;;  %s583_s4 = inlined_call_operand.vmem [shape: f32[1,128], index: 4, kind: input, shape index: {}]   ;;  %s584_s5 = inlined_call_operand.hbm [shape: f32[8,128], index: 5, kind: output, shape index: {}]  }
   0x1   :  { %11 = vsyncpa [#allocation6], 0 }
   0x2   :  { %12 = vsyncpa [#allocation4], 0  ;;  %s522_s18 = smov [#allocation5]  }
   0x3   :  { %s28_s19 = sshll.u32 %s522_s18, 4  ;;  %s29_s19 = int_to_ptr.vmem [resolvable:$true] %s28_s19 }
   0x4   :  { %s444_s20 = scalar_lea.vmem %s29_s19, 512  ;;  %p449_p1 = scmp.lt.s32.totalorder %s29_s19, %s29_s19 }
   0x5   :  { %p445_p0 = scmp.ne.s32.totalorder %s29_s19, %s444_s20  ;;  %p450_p2 = scmp.lt.s32.totalorder %s444_s20, %s444_s20 }
   0x7   :  { %p451_p3 = por %p450_p2, %p449_p1 }
   0x9   :  { %p452_p4 = pnand %p451_p3, %p445_p0 }
   0xb   :  { %455 = shalt.err (!%p452_p4)
}
   0xc   :  { %s523_s21 = smov 128   ;;  %s524_s22 = smov 8  }
   0xd   :  { %34 = dma.hbm_to_vmem [thread:$0]  %s580_s1, 512, %s29_s19, [#allocation6], %s523_s21, %s523_s21, %s524_s22  }
   0xe   :  { %s525_s25 = smov [#allocation2]   ;;  %s526_s27 = smov [#allocation7]  }
   0xf   :  { %s19_s26 = sshll.u32 %s525_s25, 4  ;;  %s42_s28 = sshll.u32 %s526_s27, 4  ;;  %s20_s26 = int_to_ptr.vmem [resolvable:$true] %s19_s26  ;;  %s43_s28 = int_to_ptr.vmem [resolvable:$true] %s42_s28 }
  0x10   :  { %s464_s29 = scalar_lea.vmem %s20_s26, 64  ;;  %p469_p6 = scmp.lt.s32.totalorder %s20_s26, %s20_s26 }
  0x11   :  { %p465_p5 = scmp.ne.s32.totalorder %s20_s26, %s464_s29  ;;  %p470_p7 = scmp.lt.s32.totalorder %s464_s29, %s464_s29 }
  0x13   :  { %p471_p8 = por %p470_p7, %p469_p6 }
  0x15   :  { %p472_p9 = pnand %p471_p8, %p465_p5 }
  0x17   :  { %475 = shalt.err (!%p472_p9)
}
  0x18   :  { %22 = dma.hbm_to_vmem [thread:$0]  %s579_s0, 64, %s20_s26, [#allocation3]  }
  0x19   :  { %s484_s7 = scalar_lea.vmem %s43_s28, 2048  ;;  %p489_p11 = scmp.lt.s32.totalorder %s43_s28, %s43_s28 }
  0x1a   :  { %p485_p10 = scmp.ne.s32.totalorder %s43_s28, %s484_s7  ;;  %p490_p12 = scmp.lt.s32.totalorder %s484_s7, %s484_s7 }
  0x1c   :  { %p491_p13 = por %p490_p12, %p489_p11 }
  0x1e   :  { %p492_p0 = pnand %p491_p13, %p485_p10 }
  0x20   :  { %495 = shalt.err (!%p492_p0)
}
  0x21   :  { %s527_s1 = smov 64   ;;  %s528_s8 = smov 4  }
  0x22   :  { %48 = dma.hbm_to_vmem [thread:$0]  %s582_s3, 2048, %s43_s28, [#allocation6], %s527_s1, %s527_s1, %s528_s8  }
  0x23   :  { %516 = dma.done.wait [#allocation3], 64  }
  0x24   :  { %517 = vsyncadd [#allocation3], 4294967232 }
  0x25   :  { %518 = dma.done.wait [#allocation6], 2560  }
  0x26   :  { %519 = vsyncadd [#allocation6], 4294964736  ;;  %v529_v0 = vmov 0   ;;  %v406_v1 = vld [vmem:[#allocation5 + $0x14] ss:$8 sps:$4 sm:$0xff]   ;;  %vm98_vm0 = vcmask 261120   ;;  %v68_v22 = vlaneseq }
  0x27   :  { %134 = vmatprep.mubr.bf16.mxu0 %v529_v0  ;;  %v408_v2 = vld [vmem:[#allocation5 + $0x10] ss:$8 sps:$4 sm:$0xff]   ;;  %114 = vmatprep.subr.bf16.mxu0 %v406_v1  ;;  %v409_v3 = vld [vmem:[#allocation5 + $0x4] ss:$8 sps:$4 sm:$0xff]   ;;  %v411_v4 = vld [vmem:[#allocation5] ss:$8 sps:$4 sm:$0xff]  }
  0x28   :  { %115 = vmatpush1.bf16.msra.mxu0 %v408_v2  ;;  %v61_v5 = vld [vmem:[#allocation2] sm:$0xf]  ;;  %v414_v8 = vld [vmem:[#allocation7 + $0x70] sm:$0xff]   ;;  %v416_v10 = vld [vmem:[#allocation7 + $0x68] sm:$0xff]   ;;  %v69_v23 = vshrl.u32 %v68_v22, 7  ;;  %s530_s12 = smov [#allocation8]  }
  0x29   :  { %116 = vmatprep.subr.bf16.mxu0 %v409_v3  ;;  %v412_v6 = vld [vmem:[#allocation7 + $0x78] sm:$0xff]   ;;  %v415_v9 = vld [vmem:[#allocation7 + $0x30] sm:$0xff]   ;;  %v417_v11 = vld [vmem:[#allocation7 + $0x28] sm:$0xff]   ;;  %s341_s13 = sshll.u32 %s530_s12, 4  ;;  %s342_s13 = int_to_ptr.vmem [resolvable:$true] %s341_s13 }
  0x2a   :  { %v413_v7 = vld [vmem:[#allocation7 + $0x38] sm:$0xff]   ;;  %375 = vmatprep.subr.bf16.mxu1 %v412_v6  ;;  %v418_v12 = vld [vmem:[#allocation7 + $0x60] sm:$0xff]   ;;  %v422_v16 = vld [vmem:[#allocation7 + $0x50] sm:$0xff]   ;;  %v70_v24 = vsub.s32 0, %v69_v23  ;;  %v74_v26 = vsub.s32 1, %v69_v23  ;;  %s496_s14 = scalar_lea.vmem %s342_s13, 128  ;;  %p501_p2 = scmp.lt.s32.totalorder %s342_s13, %s342_s13 }
  0x2b   :  { %376 = vmatpush3.bf16.msra.mxu1 %v413_v7  ;;  %v419_v13 = vld [vmem:[#allocation7 + $0x20] sm:$0xff]   ;;  %v420_v14 = vld [vmem:[#allocation7 + $0x58] sm:$0xff]   ;;  %v423_v17 = vld [vmem:[#allocation7 + $0x10] sm:$0xff]   ;;  %p497_p1 = scmp.ne.s32.totalorder %s342_s13, %s496_s14  ;;  %p502_p3 = scmp.lt.s32.totalorder %s496_s14, %s496_s14 }
  0x2c   :  { %117 = vmatpush1.bf16.msra.mxu0 %v411_v4  ;;  %377 = vmatprep.subr.bf16.mxu1 %v414_v8  ;;  %v421_v15 = vld [vmem:[#allocation7 + $0x18] sm:$0xff]   ;;  %v424_v18 = vld [vmem:[#allocation7 + $0x48] sm:$0xff]   ;;  %v426_v20 = vld [vmem:[#allocation7 + $0x40] sm:$0xff]  }
  0x2d   :  { %v425_v19 = vld [vmem:[#allocation7 + $0x8] sm:$0xff]   ;;  %v427_v21 = vld [vmem:[#allocation7] sm:$0xff]   ;;  %v66_v25 = vld [vmem:[%s581_s2] sm:$0x3]  ;;  %p503_p4 = por %p502_p3, %p501_p2 }
  0x2e   :  { %v71_v27 = vrot.slane %v66_v25, %v70_v24  ;;  %v75_v28 = vrot.slane %v66_v25, %v74_v26  ;;  %v358_v48 = vld [vmem:[%s583_s4] ss:$0 sm:$0xff] }
  0x2f   :  { %355 = vmatmul.mubr.msk.bf16.vlgmr.msra.gmra.mxu0 %vm98_vm0, %v61_v5  ;;  %378 = vmatpush3.bf16.msra.mxu1 %v415_v9  ;;  %p504_p5 = pnand %p503_p4, %p497_p1 }
  0x30   :  { %379 = vmatprep.subr.bf16.mxu1 %v416_v10 }
  0x33   :  { %380 = vmatpush3.bf16.msra.mxu1 %v417_v11 }
  0x34   :  { %381 = vmatprep.subr.bf16.mxu1 %v418_v12 }
  0x37   :  { %382 = vmatpush3.bf16.msra.mxu1 %v419_v13 }
  0x38   :  { %383 = vmatprep.subr.bf16.mxu1 %v420_v14 }
  0x3b   :  { %384 = vmatpush3.bf16.msra.mxu1 %v421_v15 }
  0x3c   :  { %385 = vmatprep.subr.bf16.mxu1 %v422_v16 }
  0x3f   :  { %386 = vmatpush3.bf16.msra.mxu1 %v423_v17 }
  0x40   :  { %387 = vmatprep.subr.bf16.mxu1 %v424_v18 }
  0x43   :  { %388 = vmatpush3.bf16.msra.mxu1 %v425_v19 }
  0x44   :  { %389 = vmatprep.subr.bf16.mxu1 %v426_v20 }
  0x47   :  { %390 = vmatpush3.bf16.msra.mxu1 %v427_v21 }
  0xef   :  { %v136_v29 = vpop.f32.mrf.mxu0 }
  0xf0   :  { %v137_v30 = vadd.f32 %v136_v29, %v71_v27 }
  0xf1   :  { %v138_v31 = vpop.f32.mrf.mxu0 }
  0xf2   :  { %v356_v32 = vmul.f32 -1.442695, %v137_v30  ;;  %v139_v33 = vadd.f32 %v138_v31, %v75_v28 }
  0xf3   :  { %v140_v34 = vpop.f32.mrf.mxu0 }
  0xf4   :  { %428 = vpow2.f32 %v356_v32  ;;  %v357_v35 = vmul.f32 -1.442695, %v139_v33 }
  0xf5   :  { %v141_v36 = vpop.f32.mrf.mxu0 }
  0xf6   :  { %430 = vpow2.f32 %v357_v35 }
 0x101   :  { %v429_v37 = vpop.eup %428 }
 0x102   :  { %v149_v38 = vadd.f32 1.0, %v429_v37 }
 0x103   :  { %v431_v39 = vpop.eup %430 }
 0x104   :  { %432 = vrcp.f32 %v149_v38  ;;  %v150_v40 = vadd.f32 1.0, %v431_v39 }
 0x106   :  { %434 = vrcp.f32 %v150_v40 }
 0x111   :  { %v433_v41 = vpop.eup %432 }
 0x112   :  { %v155_v43 = vmul.f32 %v433_v41, %v137_v30 }
 0x113   :  { %v435_v42 = vpop.eup %434 }
 0x114   :  { %v156_v44 = vmul.f32 %v435_v42, %v139_v33  ;;  %v157_v46 = vpack.c.bf16 %v155_v43, %v155_v43 }
 0x116   :  { %v158_v45 = vpack.c.bf16 %v156_v44, %v156_v44 }
 0x118   :  { %326 = vmatprep.mubr.bf16.mxu1 %v158_v45 }
 0x119   :  { %327 = vmatmul.mubr.bf16.vlgmr.msra.gmra.mxu1 %v157_v46 }
 0x1d9   :  { %v391_v47 = vpop.f32.mrf.mxu1 }
 0x1db   :  { %v392_v49 = vpop.f32.mrf.mxu1 }
 0x1dc   :  { %v393_v50 = vadd.f32 %v392_v49, %v391_v47 }
 0x1dd   :  { %v394_v51 = vpop.f32.mrf.mxu1 }
 0x1de   :  { %v329_v52 = vadd.f32 %v393_v50, %v358_v48 }
 0x1df   :  { %v395_v53 = vpop.f32.mrf.mxu1 }
 0x1e0   :  { %334 = vst [vmem:[#allocation8] sm:$0xff] %v329_v52 }
 0x1e1   :  { %507 = shalt.err (!%p504_p5)
}
 0x1e2   :  { %344 = dma.vmem_to_hbm [thread:$0]  %s342_s13, 128, %s584_s5, [#allocation4]  }
 0x1e3   :  { %520 = dma.done.wait [#allocation4], 128  }
 0x1e4   :  { %521 = vsyncadd [#allocation4], 4294967168 }
 0x1e5   :  { %348 = vsyncpa [#allocation3], 1 }
 0x1e6   :  { %349 = vsyncpa [#allocation6], 1 }
 0x1e7   :  { %350 = vsyncpa [#allocation4], 1 }

</bundles_post_ra>
